<compile_context>
chip_gen: v6e
topology: v6e:2x2x1
jax: 0.10.0
libtpu: 0.0.40
codegen_flags: <defaults>
</compile_context>

<pallas_src>
import functools

import jax
import jax.numpy as jnp
from jax.experimental import pallas as pl
from jax.experimental.pallas import tpu as pltpu

_LANE = 128
_SUBLANE = 8
_PAD_LOGIT = -120.0     # sigmoid(-120) == 0 in f32 -> masked elems contribute 0
# Rows of 128 lanes per streamed chunk: 4096 rows -> 2 MiB per f32 input block,
# 8 MiB across 2 inputs x 2 pipeline buffers; with elementwise temporaries this
# stays well inside the 48 MiB scoped-VMEM request on v5e/v6e/v7x.
_MAX_CHUNK_ROWS = 4096
_VMEM_LIMIT = 48 * 1024 * 1024


def _cdiv(a, b):
    return -(-a // b)


def _round_up(x, m):
    return ((x + m - 1) // m) * m


def _soft_iou_partials_kernel(pred_ref, tgt_ref, out_ref, *, ts, nkh, n_elems,
                              needs_mask):
    # pred_ref / tgt_ref : (1, ts, 128) lane-dense chunk of one sample.
    # out_ref            : (1, 1, 4, 8, 128) per-(sample, half) accumulator,
    #                      resident across the (arbitrary) chunk axis; rows
    #                      0..3 hold partial sums of [p*t, p, t, bce].
    c = pl.program_id(1)            # core-split half
    k = pl.program_id(2)            # chunk within this half (reduction axis)

    @pl.when(k == 0)
    def _():
        out_ref[...] = jnp.zeros_like(out_ref)

    x = pred_ref[0].astype(jnp.float32)
    t = tgt_ref[0].astype(jnp.float32)

    if needs_mask:
        # Logical element offset of this block.  The ragged tail / a duplicated
        # (clamped) block of the second half is zeroed out here instead of
        # padding the inputs in HBM.
        chunk = c * nkh + k
        rem = n_elems - chunk * (ts * _LANE)    # valid elements in this chunk
        row = jax.lax.broadcasted_iota(jnp.int32, (ts, _LANE), 0)
        lane = jax.lax.broadcasted_iota(jnp.int32, (ts, _LANE), 1)
        valid = (row * _LANE + lane) < rem
        # x -> -120 gives sigmoid(x) == 0; with t -> 0 every partial sum
        # (p*t, p, t, bce) contributes exactly zero for masked elements.
        x = jnp.where(valid, x, _PAD_LOGIT)
        t = jnp.where(valid, t, 0.0)

    p = jax.nn.sigmoid(x)
    # Exact nn.BCELoss semantics: log(p) and log(1-p) each clamped at -100.
    log_p = jnp.maximum(jnp.log(p), -100.0)
    log_1mp = jnp.maximum(jnp.log(1.0 - p), -100.0)
    bce = -(t * log_p + (1.0 - t) * log_1mp)

    def vreg_sum(q):
        # (ts, 128) -> (8, 128): groups of 8 sublanes are whole (8,128) vreg
        # tiles, so this is pure VALU vreg adds — no cross-lane movement and
        # no large accumulator slab in VMEM.
        return jnp.sum(q.reshape(ts // _SUBLANE, _SUBLANE, _LANE), axis=0)

    out_ref[0, 0, 0] += vreg_sum(p * t)
    out_ref[0, 0, 1] += vreg_sum(p)
    out_ref[0, 0, 2] += vreg_sum(t)
    out_ref[0, 0, 3] += vreg_sum(bce)


def soft_iou_loss(pred, target, *, max_chunk_rows=_MAX_CHUNK_ROWS):
    """Pallas implementation of SoftIoULoss.forward(pred, target).

    pred, target: arrays of shape (B, C, H, W) (any float dtype; not upcast in
    the wrapper).  Returns a scalar f32 loss.
    """
    assert pred.shape == target.shape
    B = pred.shape[0]
    n_elems = 1
    for d in pred.shape[1:]:
        n_elems *= int(d)

    # Flatten to (B, N) (free on contiguous NCHW) and view as lane-dense
    # (B, rows, 128).  Chunk/tail raggedness is handled by the in-kernel mask;
    # a padding copy only happens in the rare N % 1024 != 0 case.
    # TODO(synk): remove the remaining jnp.pad for N % 1024 != 0 via manual DMA.
    p_flat = pred.reshape(B, n_elems)
    t_flat = target.reshape(B, n_elems)
    n_padded = _round_up(n_elems, _SUBLANE * _LANE)
    if n_padded != n_elems:
        pad = n_padded - n_elems
        p_flat = jnp.pad(p_flat, ((0, 0), (0, pad)))
        t_flat = jnp.pad(t_flat, ((0, 0), (0, pad)))

    rows = n_padded // _LANE                      # multiple of 8, >= 8
    ts_max = max(_SUBLANE, (int(max_chunk_rows) // _SUBLANE) * _SUBLANE)
    num_chunks = _cdiv(rows, ts_max)
    ts = _round_up(_cdiv(rows, num_chunks), _SUBLANE)   # balanced chunk size
    num_chunks = _cdiv(rows, ts)
    # 2-way split of the chunk stream keeps both v7x TensorCores busy even for
    # B = 1 / odd B; each half owns its own accumulator block.
    n_split = 2 if num_chunks >= 2 else 1
    nkh = _cdiv(num_chunks, n_split)
    needs_mask = (n_split * nkh * ts * _LANE) != n_elems

    p3 = p_flat.reshape(B, rows, _LANE)
    t3 = t_flat.reshape(B, rows, _LANE)

    kernel = functools.partial(_soft_iou_partials_kernel, ts=ts, nkh=nkh,
                               n_elems=n_elems, needs_mask=needs_mask)

    def in_map(b, c, k):
        # Clamp so a ragged second half never requests a block past the array;
        # the in-kernel mask zeroes the duplicated block's contribution.
        return (b, jnp.minimum(c * nkh + k, num_chunks - 1), 0)

    partials = pl.pallas_call(
        kernel,
        out_shape=jax.ShapeDtypeStruct((B, n_split, 4, _SUBLANE, _LANE),
                                       jnp.float32),
        grid_spec=pltpu.PrefetchScalarGridSpec(
            num_scalar_prefetch=0,
            grid=(B, n_split, nkh),
            in_specs=[
                pl.BlockSpec((1, ts, _LANE), in_map),
                pl.BlockSpec((1, ts, _LANE), in_map),
            ],
            out_specs=pl.BlockSpec((1, 1, 4, _SUBLANE, _LANE),
                                   lambda b, c, k: (b, c, 0, 0, 0)),
        ),
        compiler_params=pltpu.CompilerParams(
            dimension_semantics=("parallel", "parallel", "arbitrary"),
            vmem_limit_bytes=_VMEM_LIMIT,
        ),
    )(p3, t3)

    # Tiny epilogue in plain JAX: finish the (n_split, 8, 128) reductions.
    sums = jnp.sum(partials, axis=(1, 3, 4))      # (B, 4) f32
    inter_sum = sums[:, 0]
    pred_sum = sums[:, 1]
    tgt_sum = sums[:, 2]
    bce_sum = sums[:, 3]

    smooth = 0.0                                   # matches the PyTorch module
    iou = (inter_sum + smooth) / (pred_sum + tgt_sum - inter_sum + smooth)
    loss = 1.0 - jnp.mean(iou)
    # nn.BCELoss(reduction='mean'): mean over every true (unmasked) element.
    loss1 = jnp.sum(bce_sum) / jnp.float32(B * n_elems)
    return loss + loss1


def _reference(pred, target):
    # Pure-JAX reference mirroring the PyTorch forward (incl. BCELoss clamps).
    p = jax.nn.sigmoid(pred.astype(jnp.float32))
    t = target.astype(jnp.float32)
    axes = tuple(range(1, pred.ndim))
    inter = jnp.sum(p * t, axis=axes)
    ps = jnp.sum(p, axis=axes)
    tss = jnp.sum(t, axis=axes)
    loss = 1.0 - jnp.mean(inter / (ps + tss - inter))
    bce = -jnp.mean(t * jnp.maximum(jnp.log(p), -100.0)
                    + (1.0 - t) * jnp.maximum(jnp.log(1.0 - p), -100.0))
    return loss + bce


if __name__ == "__main__":
    key = jax.random.PRNGKey(0)

    def run_case(shape, **kw):
        k1, k2 = jax.random.split(jax.random.fold_in(key, sum(shape)))
        pred = jax.random.normal(k1, shape, dtype=jnp.float32)
        target = (jax.random.uniform(k2, shape) > 0.5).astype(jnp.float32)
        fn = jax.jit(functools.partial(soft_iou_loss, **kw))
        out = jax.block_until_ready(fn(pred, target))
        ref = _reference(pred, target)
        assert jnp.allclose(out, ref, atol=1e-4, rtol=1e-4), (shape, out, ref)

    # Primary small case matching the module's (B, C, H, W) input.
    run_case((2, 4, 16, 16))
    # Ragged element count (N % 1024 != 0) -> exercises the in-kernel mask.
    run_case((2, 3, 10, 30))
    # Multi-chunk streaming + 2-way core split with an odd chunk count
    # (exercises the clamped / masked duplicate block path) at a tiny size.
    run_case((2, 4, 16, 48), max_chunk_rows=8)

    print("KERNEL_OK")
</pallas_src>

<mosaic_0001>
module attributes {stable_mosaic.version = 11 : i64} {
  func.func @_soft_iou_partials_kernel(%arg0: i32, %arg1: i32, %arg2: i32, %arg3: memref<1x8x128xf32, #tpu.memory_space<vmem>>, %arg4: memref<1x8x128xf32, #tpu.memory_space<vmem>>, %arg5: memref<1x1x4x8x128xf32, #tpu.memory_space<vmem>>) attributes {dimension_semantics = [#tpu.dimension_semantics<parallel>, #tpu.dimension_semantics<parallel>, #tpu.dimension_semantics<arbitrary>], iteration_bounds = array<i64: 2, 1, 1>, scalar_prefetch = 0 : i64, scratch_operands = 0 : i64, tpu.core_type = #tpu.core_type<tc>, window_params = [{transform_indices = @transform_0, window_bounds = array<i64: 1, 8, 128>}, {transform_indices = @transform_1, window_bounds = array<i64: 1, 8, 128>}, {transform_indices = @transform_2, window_bounds = array<i64: 1, 1, 4, 8, 128>}]} {
    %c0_i32 = arith.constant 0 : i32
    %0 = arith.cmpi eq, %arg2, %c0_i32 : i32
    %1 = arith.extui %0 : i1 to i32
    %c0_i32_0 = arith.constant 0 : i32
    %2 = arith.cmpi ne, %1, %c0_i32_0 : i32
    scf.if %2 {
      %cst_52 = arith.constant 0.000000e+00 : f32
      %60 = vector.broadcast %cst_52 : f32 to vector<1x1x4x8x128xf32>
      %c0_53 = arith.constant 0 : index
      %c0_54 = arith.constant 0 : index
      %c0_55 = arith.constant 0 : index
      %c0_56 = arith.constant 0 : index
      %c0_57 = arith.constant 0 : index
      %61 = vector.load %arg5[%c0_53, %c0_54, %c0_55, %c0_56, %c0_57] : memref<1x1x4x8x128xf32, #tpu.memory_space<vmem>>, vector<1x1x4x8x128xf32>
      tpu.vector_store %arg5[%c0_53, %c0_54, %c0_55, %c0_56, %c0_57], %60 {strides = array<i32>} : memref<1x1x4x8x128xf32, #tpu.memory_space<vmem>>, vector<1x1x4x8x128xf32>,
    } else {
    }
    %c0 = arith.constant 0 : index
    %c0_1 = arith.constant 0 : index
    %c0_2 = arith.constant 0 : index
    %3 = vector.load %arg3[%c0, %c0_1, %c0_2] : memref<1x8x128xf32, #tpu.memory_space<vmem>>, vector<1x8x128xf32>
    %4 = vector.shape_cast %3 : vector<1x8x128xf32> to vector<8x128xf32>
    %c0_3 = arith.constant 0 : index
    %c0_4 = arith.constant 0 : index
    %c0_5 = arith.constant 0 : index
    %5 = vector.load %arg4[%c0_3, %c0_4, %c0_5] : memref<1x8x128xf32, #tpu.memory_space<vmem>>, vector<1x8x128xf32>
    %6 = vector.shape_cast %5 : vector<1x8x128xf32> to vector<8x128xf32>
    %7 = arith.negf %4 : vector<8x128xf32>
    %8 = math.exp %7 : vector<8x128xf32>
    %cst = arith.constant 1.000000e+00 : f32
    %9 = vector.broadcast %cst : f32 to vector<8x128xf32>
    %10 = arith.addf %9, %8 : vector<8x128xf32>
    %11 = arith.divf %9, %10 : vector<8x128xf32>
    %12 = math.log %11 : vector<8x128xf32>
    %cst_6 = arith.constant -1.000000e+02 : f32
    %13 = vector.broadcast %cst_6 : f32 to vector<8x128xf32>
    %14 = arith.maximumf %12, %13 : vector<8x128xf32>
    %cst_7 = arith.constant 1.000000e+00 : f32
    %15 = vector.broadcast %cst_7 : f32 to vector<8x128xf32>
    %16 = arith.subf %15, %11 : vector<8x128xf32>
    %17 = math.log %16 : vector<8x128xf32>
    %cst_8 = arith.constant -1.000000e+02 : f32
    %18 = vector.broadcast %cst_8 : f32 to vector<8x128xf32>
    %19 = arith.maximumf %17, %18 : vector<8x128xf32>
    %20 = arith.mulf %6, %14 : vector<8x128xf32>
    %cst_9 = arith.constant 1.000000e+00 : f32
    %21 = vector.broadcast %cst_9 : f32 to vector<8x128xf32>
    %22 = arith.subf %21, %6 : vector<8x128xf32>
    %23 = arith.mulf %22, %19 : vector<8x128xf32>
    %24 = arith.addf %20, %23 : vector<8x128xf32>
    %cst_10 = arith.constant 0.000000e+00 : f32
    %25 = vector.broadcast %cst_10 : f32 to vector<8x128xf32>
    %26 = arith.subf %25, %24 : vector<8x128xf32>
    %c0_11 = arith.constant 0 : index
    %c0_12 = arith.constant 0 : index
    %c0_13 = arith.constant 0 : index
    %c0_14 = arith.constant 0 : index
    %c0_15 = arith.constant 0 : index
    %27 = vector.load %arg5[%c0_11, %c0_12, %c0_13, %c0_14, %c0_15] : memref<1x1x4x8x128xf32, #tpu.memory_space<vmem>>, vector<1x1x1x8x128xf32>
    %28 = vector.shape_cast %27 : vector<1x1x1x8x128xf32> to vector<8x128xf32>
    %29 = arith.mulf %11, %6 : vector<8x128xf32>
    %30 = vector.shape_cast %29 : vector<8x128xf32> to vector<1x8x128xf32>
    %cst_16 = arith.constant dense<0.000000e+00> : vector<8x128xf32>
    %31 = vector.multi_reduction <add>, %30, %cst_16 [0] : vector<1x8x128xf32> to vector<8x128xf32>
    %32 = arith.addf %28, %31 : vector<8x128xf32>
    %c0_17 = arith.constant 0 : index
    %c0_18 = arith.constant 0 : index
    %c0_19 = arith.constant 0 : index
    %c0_20 = arith.constant 0 : index
    %c0_21 = arith.constant 0 : index
    %33 = vector.load %arg5[%c0_17, %c0_18, %c0_19, %c0_20, %c0_21] : memref<1x1x4x8x128xf32, #tpu.memory_space<vmem>>, vector<1x1x1x8x128xf32>
    %34 = vector.shape_cast %33 : vector<1x1x1x8x128xf32> to vector<8x128xf32>
    %35 = vector.shape_cast %32 : vector<8x128xf32> to vector<1x1x1x8x128xf32>
    tpu.vector_store %arg5[%c0_17, %c0_18, %c0_19, %c0_20, %c0_21], %35 {strides = array<i32>} : memref<1x1x4x8x128xf32, #tpu.memory_space<vmem>>, vector<1x1x1x8x128xf32>,
    %c0_22 = arith.constant 0 : index
    %c0_23 = arith.constant 0 : index
    %c1 = arith.constant 1 : index
    %c0_24 = arith.constant 0 : index
    %c0_25 = arith.constant 0 : index
    %36 = vector.load %arg5[%c0_22, %c0_23, %c1, %c0_24, %c0_25] : memref<1x1x4x8x128xf32, #tpu.memory_space<vmem>>, vector<1x1x1x8x128xf32>
    %37 = vector.shape_cast %36 : vector<1x1x1x8x128xf32> to vector<8x128xf32>
    %38 = vector.shape_cast %11 : vector<8x128xf32> to vector<1x8x128xf32>
    %cst_26 = arith.constant dense<0.000000e+00> : vector<8x128xf32>
    %39 = vector.multi_reduction <add>, %38, %cst_26 [0] : vector<1x8x128xf32> to vector<8x128xf32>
    %40 = arith.addf %37, %39 : vector<8x128xf32>
    %c0_27 = arith.constant 0 : index
    %c0_28 = arith.constant 0 : index
    %c1_29 = arith.constant 1 : index
    %c0_30 = arith.constant 0 : index
    %c0_31 = arith.constant 0 : index
    %41 = vector.load %arg5[%c0_27, %c0_28, %c1_29, %c0_30, %c0_31] : memref<1x1x4x8x128xf32, #tpu.memory_space<vmem>>, vector<1x1x1x8x128xf32>
    %42 = vector.shape_cast %41 : vector<1x1x1x8x128xf32> to vector<8x128xf32>
    %43 = vector.shape_cast %40 : vector<8x128xf32> to vector<1x1x1x8x128xf32>
    tpu.vector_store %arg5[%c0_27, %c0_28, %c1_29, %c0_30, %c0_31], %43 {strides = array<i32>} : memref<1x1x4x8x128xf32, #tpu.memory_space<vmem>>, vector<1x1x1x8x128xf32>,
    %c0_32 = arith.constant 0 : index
    %c0_33 = arith.constant 0 : index
    %c2 = arith.constant 2 : index
    %c0_34 = arith.constant 0 : index
    %c0_35 = arith.constant 0 : index
    %44 = vector.load %arg5[%c0_32, %c0_33, %c2, %c0_34, %c0_35] : memref<1x1x4x8x128xf32, #tpu.memory_space<vmem>>, vector<1x1x1x8x128xf32>
    %45 = vector.shape_cast %44 : vector<1x1x1x8x128xf32> to vector<8x128xf32>
    %46 = vector.shape_cast %6 : vector<8x128xf32> to vector<1x8x128xf32>
    %cst_36 = arith.constant dense<0.000000e+00> : vector<8x128xf32>
    %47 = vector.multi_reduction <add>, %46, %cst_36 [0] : vector<1x8x128xf32> to vector<8x128xf32>
    %48 = arith.addf %45, %47 : vector<8x128xf32>
    %c0_37 = arith.constant 0 : index
    %c0_38 = arith.constant 0 : index
    %c2_39 = arith.constant 2 : index
    %c0_40 = arith.constant 0 : index
    %c0_41 = arith.constant 0 : index
    %49 = vector.load %arg5[%c0_37, %c0_38, %c2_39, %c0_40, %c0_41] : memref<1x1x4x8x128xf32, #tpu.memory_space<vmem>>, vector<1x1x1x8x128xf32>
    %50 = vector.shape_cast %49 : vector<1x1x1x8x128xf32> to vector<8x128xf32>
    %51 = vector.shape_cast %48 : vector<8x128xf32> to vector<1x1x1x8x128xf32>
    tpu.vector_store %arg5[%c0_37, %c0_38, %c2_39, %c0_40, %c0_41], %51 {strides = array<i32>} : memref<1x1x4x8x128xf32, #tpu.memory_space<vmem>>, vector<1x1x1x8x128xf32>,
    %c0_42 = arith.constant 0 : index
    %c0_43 = arith.constant 0 : index
    %c3 = arith.constant 3 : index
    %c0_44 = arith.constant 0 : index
    %c0_45 = arith.constant 0 : index
    %52 = vector.load %arg5[%c0_42, %c0_43, %c3, %c0_44, %c0_45] : memref<1x1x4x8x128xf32, #tpu.memory_space<vmem>>, vector<1x1x1x8x128xf32>
    %53 = vector.shape_cast %52 : vector<1x1x1x8x128xf32> to vector<8x128xf32>
    %54 = vector.shape_cast %26 : vector<8x128xf32> to vector<1x8x128xf32>
    %cst_46 = arith.constant dense<0.000000e+00> : vector<8x128xf32>
    %55 = vector.multi_reduction <add>, %54, %cst_46 [0] : vector<1x8x128xf32> to vector<8x128xf32>
    %56 = arith.addf %53, %55 : vector<8x128xf32>
    %c0_47 = arith.constant 0 : index
    %c0_48 = arith.constant 0 : index
    %c3_49 = arith.constant 3 : index
    %c0_50 = arith.constant 0 : index
    %c0_51 = arith.constant 0 : index
    %57 = vector.load %arg5[%c0_47, %c0_48, %c3_49, %c0_50, %c0_51] : memref<1x1x4x8x128xf32, #tpu.memory_space<vmem>>, vector<1x1x1x8x128xf32>
    %58 = vector.shape_cast %57 : vector<1x1x1x8x128xf32> to vector<8x128xf32>
    %59 = vector.shape_cast %56 : vector<8x128xf32> to vector<1x1x1x8x128xf32>
    tpu.vector_store %arg5[%c0_47, %c0_48, %c3_49, %c0_50, %c0_51], %59 {strides = array<i32>} : memref<1x1x4x8x128xf32, #tpu.memory_space<vmem>>, vector<1x1x1x8x128xf32>,
    return
  }
  func.func @transform_0(%arg0: i32, %arg1: i32, %arg2: i32) -> (i32, i32, i32) {
    %c1_i32 = arith.constant 1 : i32
    %0 = arith.muli %arg1, %c1_i32 : i32
    %1 = arith.addi %0, %arg2 : i32
    %c0_i32 = arith.constant 0 : i32
    %2 = arith.minsi %1, %c0_i32 : i32
    %c0_i32_0 = arith.constant 0 : i32
    %c0_i32_1 = arith.constant 0 : i32
    return %arg0, %2, %c0_i32_0 : i32, i32, i32
  }
  func.func @transform_1(%arg0: i32, %arg1: i32, %arg2: i32) -> (i32, i32, i32) {
    %c1_i32 = arith.constant 1 : i32
    %0 = arith.muli %arg1, %c1_i32 : i32
    %1 = arith.addi %0, %arg2 : i32
    %c0_i32 = arith.constant 0 : i32
    %2 = arith.minsi %1, %c0_i32 : i32
    %c0_i32_0 = arith.constant 0 : i32
    %c0_i32_1 = arith.constant 0 : i32
    return %arg0, %2, %c0_i32_0 : i32, i32, i32
  }
  func.func @transform_2(%arg0: i32, %arg1: i32, %arg2: i32) -> (i32, i32, i32, i32, i32) {
    %c0_i32 = arith.constant 0 : i32
    %c0_i32_0 = arith.constant 0 : i32
    %c0_i32_1 = arith.constant 0 : i32
    %c0_i32_2 = arith.constant 0 : i32
    return %arg0, %arg1, %c0_i32, %c0_i32_0, %c0_i32_1 : i32, i32, i32, i32, i32
  }
}

</mosaic_0001>

<bundles_post_ra>
// kernel: soft_iou_loss.1
= control target key start
LH: loop header
LB: loop body
LE: loop exit
PB: predicated region body
PF: predicated region fallthrough
CT: control target
= control target key end

     0   :  { %s494_s9 = smov 0   ;;  %s496_s10 = smov 0   ;;  %s530_s0 = inlined_call_operand.vmem [shape: f32[2,8,128], index: 0, kind: input, shape index: {}]   ;;  %s531_s1 = inlined_call_operand.vmem [shape: f32[2,8,128], index: 1, kind: input, shape index: {}]   ;;  %s532_s2 = inlined_call_operand.vmem [shape: f32[2,1,4,8,128], index: 2, kind: output, shape index: {}]  }
   0x1   :  { %s498_s11 = smov 0  }
   0x2 LB: > { %s31_s12 = sadd.s32 1, %s473_s10  ;;  %p407_p0 = scmp.ge.s32.totalorder %s477_s11, 1  ;;  %s477_s11 = sphi %s498_s11, %s12_s11   ;;  %s473_s10 = sphi %s496_s10, %s534_s10   ;;  %s469_s9 = sphi %s494_s9, %s533_s9  }
   0x3   : > { %p33_p1 = scmp.ge.s32.totalorder %s31_s12, 2  ;;  %p175_p2 = scmp.lt.s32.totalorder %s477_s11, 3 }
   0x5   : > { %s536_s12 = smov (%p33_p1, %s31_s12), 0  ;;  %p176_p3 = pnand %p407_p0, %p175_p2 }
   0x6   : > { %p219_p4 = scmp.lt.s32.totalorder (!%p176_p3), %s469_s9, 1 }
   0x7   : > { %179 = sbr.rel (%p176_p3) target bundleno = 75 (0x4b), region = 28 }
   0xc   : > { %s538_s9 = smov (!%p219_p4, %s469_s9), 1 }
   0xd   : > { %s421_s13 = sshll.u32 %s538_s9, 5  ;;  %s408_s14 = sshll.u32 %s538_s9, 3 }
   0xe   : > { %s225_s17 = scalar_lea.vmem %s530_s0, %s408_s14  ;;  %s238_s20 = scalar_lea.vmem %s531_s1, %s408_s14 }
   0xf   : > { %v259_v0 = vld [vmem:[%s225_s17] sm:$0xff]  ;;  %s250_s23 = scalar_lea.vmem %s532_s2, %s421_s13 }
  0x10   : > { %v260_v1 = vld [vmem:[%s238_s20] sm:$0xff]  ;;  %v412_v2 = vmul.f32 -1.442695, %v259_v0 }
  0x11   : > { %416 = vst [vmem:[%s250_s23 + $0x10] sm:$0xff] %v260_v1  ;;  %v275_v13 = vsub.f32 1.0, %v260_v1 }
  0x12   : > { %447 = vpow2.f32 %v412_v2 }
  0x1f   : > { %v448_v3 = vpop.eup %447 }
  0x20   : > { %v264_v4 = vadd.f32 1.0, %v448_v3 }
  0x22   : > { %449 = vrcp.f32 %v264_v4 }
  0x2f   : > { %v450_v5 = vpop.eup %449 }
  0x30   : > { %v280_v6 = vmul.f32 %v450_v5, %v260_v1  ;;  %451 = vlog2.f32 %v450_v5  ;;  %v270_v7 = vsub.f32 1.0, %v450_v5  ;;  %414 = vst [vmem:[%s250_s23 + $0x8] sm:$0xff] %v450_v5 }
  0x32   : > { %453 = vlog2.f32 %v270_v7  ;;  %283 = vst [vmem:[%s250_s23] sm:$0xff] %v280_v6 }
  0x3d   : > { %v452_v8 = vpop.eup %451 }
  0x3e   : > { %v268_v9 = vmul.f32 0.6931472, %v452_v8 }
  0x3f   : > { %v454_v10 = vpop.eup %453 }
  0x40   : > { %v269_v11 = vmax.f32 %v268_v9, -100.0  ;;  %v272_v12 = vmul.f32 0.6931472, %v454_v10 }
  0x42   : > { %v273_v14 = vmax.f32 %v272_v12, -100.0  ;;  %v274_v15 = vmul.f32 %v269_v11, %v260_v1 }
  0x44   : > { %v276_v16 = vmul.f32 %v275_v13, %v273_v14 }
  0x46   : > { %v277_v17 = vadd.f32 %v276_v16, %v274_v15 }
  0x48   : > { %v278_v18 = vsub.f32 0.0, %v277_v17 }
  0x4a   : > { %418 = vst [vmem:[%s250_s23 + $0x18] sm:$0xff] %v278_v18 }
  0x4b PF: > { %s12_s11 = sadd.s32 1, %s477_s11   ;;  %s533_s9 = smov %s473_s10 }
  0x4c   : > { %p9_p5 = scmp.ge.s32.totalorder %s12_s11, 4   ;;  %s534_s10 = smov %s536_s12 }
  0x4e   :  { %11 = sbr.rel (!%p9_p5) target bundleno = 2 (0x2), region = 68 }

</bundles_post_ra>
